<compile_context>
chip_gen: v5e
topology: v5e:2x2
jax: 0.10.0
libtpu: 0.0.40
codegen_flags: <defaults>
</compile_context>

<pallas_src>
import jax
import jax.numpy as jnp
from jax import lax
from jax.experimental import pallas as pl
from jax.experimental.pallas import tpu as pltpu

KERNEL_SIZE = 8
STRIDE = 4
DEPTH = 2
CHIN = 1
HIDDEN = 8
GROWTH = 2


def _conv_out_len(t_in, kernel, stride):
    return (t_in - kernel) // stride + 1


def _make_fused_encoder_kernel(layer_meta, stride, taps, compute_dtype):
    """layer_meta: list of (h, t_out, t_in, n_s); layer-0 input is pre-phase-split."""

    def _layer(x_ps, w1_ref, w2_ref, h, t_out):
        # cols: `taps` unit-shifted sublane-stacked slices of the phase-split slab
        # plus a ones row (conv bias rides in the same MXU matmul).
        parts = [x_ps[:, j:j + t_out] for j in range(taps)]
        parts.append(jnp.ones((1, t_out), jnp.float32))
        cols = jnp.concatenate(parts, axis=0).astype(compute_dtype)      # (C*K+1, t_out)
        y = jnp.dot(w1_ref[...], cols, preferred_element_type=jnp.float32)  # (H, t_out) f32
        y = jnp.maximum(y, 0.0)                                          # f32 ReLU
        y_aug = jnp.concatenate([y, jnp.ones((1, t_out), jnp.float32)],
                                axis=0).astype(compute_dtype)            # (H+1, t_out)
        z = jnp.dot(w2_ref[...], y_aug, preferred_element_type=jnp.float32)  # (2H, t_out) f32
        # GLU over channels; keep f32 so the sublane split is exact/aligned.
        return z[:h, :] * jax.nn.sigmoid(z[h:, :])

    def body(*refs):
        n_out = len(layer_meta)
        x_ref = refs[0]
        const_refs = refs[1:len(refs) - n_out]
        out_refs = refs[len(refs) - n_out:]
        idx = 0
        act = None
        for li, (h, t_out, t_in, n_s) in enumerate(layer_meta):
            if li == 0:
                # Already phase-split by the wrapper (DMA did the layout change).
                x_ps = x_ref[0].astype(jnp.float32)                       # (stride*C, S)
            else:
                # Phase-split previous activation with one small matmul against a
                # 0/1 constant (built once on the wrapper, VMEM-resident).
                p_ref = const_refs[idx]; idx += 1
                gath = jnp.dot(act.astype(compute_dtype), p_ref[...],
                               preferred_element_type=jnp.float32)        # (C, stride*n_s)
                x_ps = jnp.concatenate(
                    [gath[:, q * n_s:(q + 1) * n_s] for q in range(stride)],
                    axis=0)                                               # (stride*C, n_s)
            w1_ref = const_refs[idx]; idx += 1
            w2_ref = const_refs[idx]; idx += 1
            act = _layer(x_ps, w1_ref, w2_ref, h, t_out)
            out_refs[li][0] = act.astype(out_refs[li].dtype)

    return body


def demucs_encode(audio, params, *, kernel=KERNEL_SIZE, stride=STRIDE,
                  compute_dtype=jnp.bfloat16):
    """Replicates DemucsEncoderONNX.forward: returns (latent, *skips)."""
    B, c_in, t_in = audio.shape
    assert kernel % stride == 0, "phase-split formulation assumes kernel % stride == 0"
    assert t_in % stride == 0, "input phase-split assumes T % stride == 0"
    taps = kernel // stride

    # Wrapper-side phase split of the raw audio (space-to-depth), done by XLA/DMA:
    #   x_ps0[b, q*C + c, s] = audio[b, c, s*stride + q]
    s0 = t_in // stride
    x_ps0 = (audio.reshape(B, c_in, s0, stride)
                  .transpose(0, 3, 1, 2)
                  .reshape(B, stride * c_in, s0)
                  .astype(compute_dtype))

    const_inputs = []        # per layer: [P (layers>=2)], w1_aug, w2_aug  -- all bf16
    layer_meta = []          # (h, t_out, t_in_layer, n_s)
    c, t = c_in, t_in
    for li, (w1, b1, w2, b2) in enumerate(params):
        h = w1.shape[0]
        t_out = _conv_out_len(t, kernel, stride)
        n_s = t_out + taps - 1
        if li > 0:
            # 0/1 phase-split matrix (exact in bf16): P[tau, q*n_s + s] = (tau == s*stride + q)
            tau = jnp.arange(t)[:, None]
            col = jnp.arange(stride * n_s)[None, :]
            P = (tau == (col % n_s) * stride + col // n_s).astype(compute_dtype)
            const_inputs.append(P)
        # Conv weight flattened to (H, K*C) with column index k*C + c, bias as extra column.
        w1_flat = jnp.transpose(w1, (0, 2, 1)).reshape(h, kernel * c)
        const_inputs.append(
            jnp.concatenate([w1_flat, b1[:, None]], axis=1).astype(compute_dtype))
        const_inputs.append(
            jnp.concatenate([w2.reshape(2 * h, h), b2[:, None]], axis=1).astype(compute_dtype))
        layer_meta.append((h, t_out, t, n_s))
        c, t = h, t_out

    in_specs = [pl.BlockSpec((1, stride * c_in, s0), lambda b: (b, 0, 0))]
    # Constant index_map -> weights / phase-split constants stay VMEM-resident across grid steps.
    in_specs += [pl.BlockSpec(w.shape, lambda b: (0, 0)) for w in const_inputs]
    out_specs = tuple(
        pl.BlockSpec((1, h, t_o), lambda b: (b, 0, 0)) for (h, t_o, _, _) in layer_meta)
    out_shape = tuple(
        jax.ShapeDtypeStruct((B, h, t_o), audio.dtype) for (h, t_o, _, _) in layer_meta)

    outs = pl.pallas_call(
        _make_fused_encoder_kernel(layer_meta, stride, taps, compute_dtype),
        out_shape=out_shape,
        grid=(B,),
        in_specs=in_specs,
        out_specs=out_specs,
        # Keep a >=2-way "parallel" grid so both v7x TensorCores get work (B=2 -> 1 item/TC).
        compiler_params=pltpu.CompilerParams(dimension_semantics=("parallel",)),
    )(x_ps0, *const_inputs)

    skips = tuple(outs)
    latent = skips[-1]
    return (latent,) + skips


# ---------------- pure-JAX reference (for verification) ----------------
def _ref_layer(x, w1, b1, w2, b2):
    y = lax.conv_general_dilated(x, w1, (STRIDE,), "VALID",
                                 dimension_numbers=("NCH", "OIH", "NCH"))
    y = jnp.maximum(y + b1[None, :, None], 0.0)
    z = lax.conv_general_dilated(y, w2, (1,), "VALID",
                                 dimension_numbers=("NCH", "OIH", "NCH"))
    z = z + b2[None, :, None]
    H = w1.shape[0]
    return z[:, :H] * jax.nn.sigmoid(z[:, H:])


def _ref_encode(audio, params):
    x = audio
    skips = []
    for (w1, b1, w2, b2) in params:
        x = _ref_layer(x, w1, b1, w2, b2)
        skips.append(x)
    return (x,) + tuple(skips)


def init_params(key):
    params = []
    chin = CHIN
    hidden = HIDDEN
    for _ in range(DEPTH):
        key, k1, k2, k3, k4 = jax.random.split(key, 5)
        w1 = 0.1 * jax.random.normal(k1, (hidden, chin, KERNEL_SIZE), jnp.float32)
        b1 = 0.1 * jax.random.normal(k2, (hidden,), jnp.float32)
        w2 = 0.1 * jax.random.normal(k3, (2 * hidden, hidden, 1), jnp.float32)
        b2 = 0.1 * jax.random.normal(k4, (2 * hidden,), jnp.float32)
        params.append((w1, b1, w2, b2))
        chin = hidden
        hidden = hidden * GROWTH
    return params


if __name__ == "__main__":
    key = jax.random.PRNGKey(0)
    key, ka = jax.random.split(key)
    B, T = 2, 256
    audio = jax.random.normal(ka, (B, CHIN, T), jnp.float32)   # NCT, like PyTorch
    params = init_params(key)

    run = jax.jit(demucs_encode)
    outs = jax.block_until_ready(run(audio, params))

    refs = _ref_encode(audio, params)
    assert len(outs) == len(refs)
    # bf16 MXU operands -> loosened tolerance vs the f32 reference.
    for o, r in zip(outs, refs):
        assert o.shape == r.shape, (o.shape, r.shape)
        assert jnp.allclose(o, r, rtol=2e-2, atol=2e-2), float(jnp.abs(o - r).max())

    print("KERNEL_OK")
</pallas_src>

<mosaic_0001>
module attributes {stable_mosaic.version = 11 : i64} {
  func.func @body(%arg0: i32, %arg1: memref<1x4x64xbf16, #tpu.memory_space<vmem>>, %arg2: memref<8x9xbf16, #tpu.memory_space<vmem>>, %arg3: memref<16x9xbf16, #tpu.memory_space<vmem>>, %arg4: memref<63x60xbf16, #tpu.memory_space<vmem>>, %arg5: memref<16x65xbf16, #tpu.memory_space<vmem>>, %arg6: memref<32x17xbf16, #tpu.memory_space<vmem>>, %arg7: memref<1x8x63xf32, #tpu.memory_space<vmem>>, %arg8: memref<1x16x14xf32, #tpu.memory_space<vmem>>) attributes {dimension_semantics = [#tpu.dimension_semantics<parallel>], iteration_bounds = array<i64: 2>, scalar_prefetch = 0 : i64, scratch_operands = 0 : i64, tpu.core_type = #tpu.core_type<tc>, window_params = [{transform_indices = @transform_0, window_bounds = array<i64: 1, 4, 64>}, {pipeline_mode = #tpu.pipeline_mode<synchronous>, transform_indices = @transform_1, window_bounds = array<i64: 8, 9>}, {pipeline_mode = #tpu.pipeline_mode<synchronous>, transform_indices = @transform_2, window_bounds = array<i64: 16, 9>}, {pipeline_mode = #tpu.pipeline_mode<synchronous>, transform_indices = @transform_3, window_bounds = array<i64: 63, 60>}, {pipeline_mode = #tpu.pipeline_mode<synchronous>, transform_indices = @transform_4, window_bounds = array<i64: 16, 65>}, {pipeline_mode = #tpu.pipeline_mode<synchronous>, transform_indices = @transform_5, window_bounds = array<i64: 32, 17>}, {transform_indices = @transform_6, window_bounds = array<i64: 1, 8, 63>}, {transform_indices = @transform_7, window_bounds = array<i64: 1, 16, 14>}]} {
    %c0 = arith.constant 0 : index
    %c0_0 = arith.constant 0 : index
    %c0_1 = arith.constant 0 : index
    %0 = vector.load %arg1[%c0, %c0_0, %c0_1] : memref<1x4x64xbf16, #tpu.memory_space<vmem>>, vector<1x4x64xbf16>
    %1 = vector.shape_cast %0 : vector<1x4x64xbf16> to vector<4x64xbf16>
    %2 = arith.extf %1 : vector<4x64xbf16> to vector<4x64xf32>
    %3 = vector.extract_strided_slice %2 {offsets = [0, 0], sizes = [4, 63], strides = [1, 1]} : vector<4x64xf32> to vector<4x63xf32>
    %4 = vector.extract_strided_slice %2 {offsets = [0, 1], sizes = [4, 63], strides = [1, 1]} : vector<4x64xf32> to vector<4x63xf32>
    %cst = arith.constant 1.000000e+00 : f32
    %5 = vector.broadcast %cst : f32 to vector<1x63xf32>
    %6 = tpu.concatenate %3, %4, %5 in 0 : vector<4x63xf32>, vector<4x63xf32>, vector<1x63xf32> -> vector<9x63xf32>
    %7 = arith.truncf %6 : vector<9x63xf32> to vector<9x63xbf16>
    %c0_2 = arith.constant 0 : index
    %c0_3 = arith.constant 0 : index
    %8 = vector.load %arg2[%c0_2, %c0_3] : memref<8x9xbf16, #tpu.memory_space<vmem>>, vector<8x9xbf16>
    %cst_4 = arith.constant dense<0.000000e+00> : vector<8x63xf32>
    %9 = tpu.matmul %8, %7, %cst_4 {dimension_numbers = #tpu.dot_dimension_numbers<[1], [0], [0], [1], [0, 0, 1, 1], [], []>} : vector<8x9xbf16>, vector<9x63xbf16>, vector<8x63xf32> -> vector<8x63xf32>
    %cst_5 = arith.constant 0.000000e+00 : f32
    %10 = vector.broadcast %cst_5 : f32 to vector<8x63xf32>
    %11 = arith.maximumf %9, %10 : vector<8x63xf32>
    %cst_6 = arith.constant 1.000000e+00 : f32
    %12 = vector.broadcast %cst_6 : f32 to vector<1x63xf32>
    %13 = tpu.concatenate %11, %12 in 0 : vector<8x63xf32>, vector<1x63xf32> -> vector<9x63xf32>
    %14 = arith.truncf %13 : vector<9x63xf32> to vector<9x63xbf16>
    %c0_7 = arith.constant 0 : index
    %c0_8 = arith.constant 0 : index
    %15 = vector.load %arg3[%c0_7, %c0_8] : memref<16x9xbf16, #tpu.memory_space<vmem>>, vector<16x9xbf16>
    %cst_9 = arith.constant dense<0.000000e+00> : vector<16x63xf32>
    %16 = tpu.matmul %15, %14, %cst_9 {dimension_numbers = #tpu.dot_dimension_numbers<[1], [0], [0], [1], [0, 0, 1, 1], [], []>} : vector<16x9xbf16>, vector<9x63xbf16>, vector<16x63xf32> -> vector<16x63xf32>
    %17 = vector.extract_strided_slice %16 {offsets = [0, 0], sizes = [8, 63], strides = [1, 1]} : vector<16x63xf32> to vector<8x63xf32>
    %18 = vector.extract_strided_slice %16 {offsets = [8, 0], sizes = [8, 63], strides = [1, 1]} : vector<16x63xf32> to vector<8x63xf32>
    %19 = arith.negf %18 : vector<8x63xf32>
    %20 = math.exp %19 : vector<8x63xf32>
    %cst_10 = arith.constant 1.000000e+00 : f32
    %21 = vector.broadcast %cst_10 : f32 to vector<8x63xf32>
    %22 = arith.addf %21, %20 : vector<8x63xf32>
    %23 = arith.divf %21, %22 : vector<8x63xf32>
    %24 = arith.mulf %17, %23 : vector<8x63xf32>
    %c0_11 = arith.constant 0 : index
    %c0_12 = arith.constant 0 : index
    %c0_13 = arith.constant 0 : index
    %25 = vector.load %arg7[%c0_11, %c0_12, %c0_13] : memref<1x8x63xf32, #tpu.memory_space<vmem>>, vector<1x8x63xf32>
    %26 = vector.shape_cast %25 : vector<1x8x63xf32> to vector<8x63xf32>
    %27 = vector.shape_cast %24 : vector<8x63xf32> to vector<1x8x63xf32>
    tpu.vector_store %arg7[%c0_11, %c0_12, %c0_13], %27 {strides = array<i32>} : memref<1x8x63xf32, #tpu.memory_space<vmem>>, vector<1x8x63xf32>,
    %28 = arith.truncf %24 : vector<8x63xf32> to vector<8x63xbf16>
    %c0_14 = arith.constant 0 : index
    %c0_15 = arith.constant 0 : index
    %29 = vector.load %arg4[%c0_14, %c0_15] : memref<63x60xbf16, #tpu.memory_space<vmem>>, vector<63x60xbf16>
    %cst_16 = arith.constant dense<0.000000e+00> : vector<8x60xf32>
    %30 = tpu.matmul %28, %29, %cst_16 {dimension_numbers = #tpu.dot_dimension_numbers<[1], [0], [0], [1], [0, 0, 1, 1], [], []>} : vector<8x63xbf16>, vector<63x60xbf16>, vector<8x60xf32> -> vector<8x60xf32>
    %31 = vector.extract_strided_slice %30 {offsets = [0, 0], sizes = [8, 15], strides = [1, 1]} : vector<8x60xf32> to vector<8x15xf32>
    %32 = vector.extract_strided_slice %30 {offsets = [0, 15], sizes = [8, 15], strides = [1, 1]} : vector<8x60xf32> to vector<8x15xf32>
    %33 = vector.extract_strided_slice %30 {offsets = [0, 30], sizes = [8, 15], strides = [1, 1]} : vector<8x60xf32> to vector<8x15xf32>
    %34 = vector.extract_strided_slice %30 {offsets = [0, 45], sizes = [8, 15], strides = [1, 1]} : vector<8x60xf32> to vector<8x15xf32>
    %35 = tpu.concatenate %31, %32, %33, %34 in 0 : vector<8x15xf32>, vector<8x15xf32>, vector<8x15xf32>, vector<8x15xf32> -> vector<32x15xf32>
    %36 = vector.extract_strided_slice %35 {offsets = [0, 0], sizes = [32, 14], strides = [1, 1]} : vector<32x15xf32> to vector<32x14xf32>
    %37 = vector.extract_strided_slice %35 {offsets = [0, 1], sizes = [32, 14], strides = [1, 1]} : vector<32x15xf32> to vector<32x14xf32>
    %cst_17 = arith.constant 1.000000e+00 : f32
    %38 = vector.broadcast %cst_17 : f32 to vector<1x14xf32>
    %39 = tpu.concatenate %36, %37, %38 in 0 : vector<32x14xf32>, vector<32x14xf32>, vector<1x14xf32> -> vector<65x14xf32>
    %40 = arith.truncf %39 : vector<65x14xf32> to vector<65x14xbf16>
    %c0_18 = arith.constant 0 : index
    %c0_19 = arith.constant 0 : index
    %41 = vector.load %arg5[%c0_18, %c0_19] : memref<16x65xbf16, #tpu.memory_space<vmem>>, vector<16x65xbf16>
    %cst_20 = arith.constant dense<0.000000e+00> : vector<16x14xf32>
    %42 = tpu.matmul %41, %40, %cst_20 {dimension_numbers = #tpu.dot_dimension_numbers<[1], [0], [0], [1], [0, 0, 1, 1], [], []>} : vector<16x65xbf16>, vector<65x14xbf16>, vector<16x14xf32> -> vector<16x14xf32>
    %cst_21 = arith.constant 0.000000e+00 : f32
    %43 = vector.broadcast %cst_21 : f32 to vector<16x14xf32>
    %44 = arith.maximumf %42, %43 : vector<16x14xf32>
    %cst_22 = arith.constant 1.000000e+00 : f32
    %45 = vector.broadcast %cst_22 : f32 to vector<1x14xf32>
    %46 = tpu.concatenate %44, %45 in 0 : vector<16x14xf32>, vector<1x14xf32> -> vector<17x14xf32>
    %47 = arith.truncf %46 : vector<17x14xf32> to vector<17x14xbf16>
    %c0_23 = arith.constant 0 : index
    %c0_24 = arith.constant 0 : index
    %48 = vector.load %arg6[%c0_23, %c0_24] : memref<32x17xbf16, #tpu.memory_space<vmem>>, vector<32x17xbf16>
    %cst_25 = arith.constant dense<0.000000e+00> : vector<32x14xf32>
    %49 = tpu.matmul %48, %47, %cst_25 {dimension_numbers = #tpu.dot_dimension_numbers<[1], [0], [0], [1], [0, 0, 1, 1], [], []>} : vector<32x17xbf16>, vector<17x14xbf16>, vector<32x14xf32> -> vector<32x14xf32>
    %50 = vector.extract_strided_slice %49 {offsets = [0, 0], sizes = [16, 14], strides = [1, 1]} : vector<32x14xf32> to vector<16x14xf32>
    %51 = vector.extract_strided_slice %49 {offsets = [16, 0], sizes = [16, 14], strides = [1, 1]} : vector<32x14xf32> to vector<16x14xf32>
    %52 = arith.negf %51 : vector<16x14xf32>
    %53 = math.exp %52 : vector<16x14xf32>
    %cst_26 = arith.constant 1.000000e+00 : f32
    %54 = vector.broadcast %cst_26 : f32 to vector<16x14xf32>
    %55 = arith.addf %54, %53 : vector<16x14xf32>
    %56 = arith.divf %54, %55 : vector<16x14xf32>
    %57 = arith.mulf %50, %56 : vector<16x14xf32>
    %c0_27 = arith.constant 0 : index
    %c0_28 = arith.constant 0 : index
    %c0_29 = arith.constant 0 : index
    %58 = vector.load %arg8[%c0_27, %c0_28, %c0_29] : memref<1x16x14xf32, #tpu.memory_space<vmem>>, vector<1x16x14xf32>
    %59 = vector.shape_cast %58 : vector<1x16x14xf32> to vector<16x14xf32>
    %60 = vector.shape_cast %57 : vector<16x14xf32> to vector<1x16x14xf32>
    tpu.vector_store %arg8[%c0_27, %c0_28, %c0_29], %60 {strides = array<i32>} : memref<1x16x14xf32, #tpu.memory_space<vmem>>, vector<1x16x14xf32>,
    return
  }
  func.func @transform_0(%arg0: i32) -> (i32, i32, i32) {
    %c0_i32 = arith.constant 0 : i32
    %c0_i32_0 = arith.constant 0 : i32
    %c0_i32_1 = arith.constant 0 : i32
    return %arg0, %c0_i32, %c0_i32_0 : i32, i32, i32
  }
  func.func @transform_1(%arg0: i32) -> (i32, i32) {
    %c0_i32 = arith.constant 0 : i32
    %c0_i32_0 = arith.constant 0 : i32
    %c0_i32_1 = arith.constant 0 : i32
    return %c0_i32, %c0_i32_0 : i32, i32
  }
  func.func @transform_2(%arg0: i32) -> (i32, i32) {
    %c0_i32 = arith.constant 0 : i32
    %c0_i32_0 = arith.constant 0 : i32
    %c0_i32_1 = arith.constant 0 : i32
    return %c0_i32, %c0_i32_0 : i32, i32
  }
  func.func @transform_3(%arg0: i32) -> (i32, i32) {
    %c0_i32 = arith.constant 0 : i32
    %c0_i32_0 = arith.constant 0 : i32
    %c0_i32_1 = arith.constant 0 : i32
    return %c0_i32, %c0_i32_0 : i32, i32
  }
  func.func @transform_4(%arg0: i32) -> (i32, i32) {
    %c0_i32 = arith.constant 0 : i32
    %c0_i32_0 = arith.constant 0 : i32
    %c0_i32_1 = arith.constant 0 : i32
    return %c0_i32, %c0_i32_0 : i32, i32
  }
  func.func @transform_5(%arg0: i32) -> (i32, i32) {
    %c0_i32 = arith.constant 0 : i32
    %c0_i32_0 = arith.constant 0 : i32
    %c0_i32_1 = arith.constant 0 : i32
    return %c0_i32, %c0_i32_0 : i32, i32
  }
  func.func @transform_6(%arg0: i32) -> (i32, i32, i32) {
    %c0_i32 = arith.constant 0 : i32
    %c0_i32_0 = arith.constant 0 : i32
    %c0_i32_1 = arith.constant 0 : i32
    return %arg0, %c0_i32, %c0_i32_0 : i32, i32, i32
  }
  func.func @transform_7(%arg0: i32) -> (i32, i32, i32) {
    %c0_i32 = arith.constant 0 : i32
    %c0_i32_0 = arith.constant 0 : i32
    %c0_i32_1 = arith.constant 0 : i32
    return %arg0, %c0_i32, %c0_i32_0 : i32, i32, i32
  }
}

</mosaic_0001>

<bundles_post_ra>
// kernel: demucs_encode.1
= control target key start
LH: loop header
LB: loop body
LE: loop exit
PB: predicated region body
PF: predicated region fallthrough
CT: control target
= control target key end

     0   :  { %s1058_s0 = inlined_call_operand.vmem [shape: bf16[2,4,64], index: 0, kind: input, shape index: {}]   ;;  %s1059_s1 = inlined_call_operand.vmem [shape: bf16[8,9], index: 1, kind: input, shape index: {}]   ;;  %s1060_s2 = inlined_call_operand.vmem [shape: bf16[16,9], index: 2, kind: input, shape index: {}]   ;;  %s1061_s3 = inlined_call_operand.vmem [shape: bf16[63,60], index: 3, kind: input, shape index: {}]   ;;  %s1062_s4 = inlined_call_operand.vmem [shape: bf16[16,65], index: 4, kind: input, shape index: {}]   ;;  %s1063_s5 = inlined_call_operand.vmem [shape: bf16[32,17], index: 5, kind: input, shape index: {}]   ;;  %s1064_s6 = inlined_call_operand.hbm [shape: f32[2,8,63], index: 6, kind: output, shape index: {0}]   ;;  %s1065_s7 = inlined_call_operand.vmem [shape: f32[2,16,14], index: 7, kind: output, shape index: {1}]  }
   0x1   :  { %1066 = sst [smem:[#allocation5_spill]] %s1058_s0 }
   0x2   :  { %13 = vsyncpa [#allocation3], 0 }
   0x3   :  { %15 = vsyncpa [#allocation3 + $0x1], 0  ;;  %s923_s24 = smov 0   ;;  %s925_s25 = smov 0  }
   0x4   :  { %s927_s26 = smov 0   ;;  %s929_s27 = smov 0  }
   0x5 LB: > { %s944_s28 = sadd.s32 4294967295, %s875_s27   ;;  %s682_s29 = sadd.s32 4294967294, %s875_s27   ;;  %s875_s27 = sphi %s929_s27, %s1073_s27   ;;  %s871_s26 = sphi %s927_s26, %s1072_s26   ;;  %s867_s25 = sphi %s925_s25, %s1071_s25   ;;  %s863_s24 = sphi %s923_s24, %s1070_s24  }
   0x6   : > { %s948_s30 = sadd.s32 1, %s875_s27   ;;  %s159_s8 = sadd.s32 1, %s871_s26 }
   0x7   : > { %s156_s9 = ssub.s32 %s875_s27, %s948_s30  ;;  %p169_p0 = scmp.ne.s32.totalorder %s871_s26, %s867_s25 }
   0x8   : > { %p157_p1 = scmp.eq.s32.totalorder %s156_s9, 0  ;;  %p170_p2 = scmp.eq.s32.totalorder %s944_s28, 1 }
   0x9   : > { %p175_p3 = scmp.ne.s32.totalorder %s867_s25, %s863_s24  ;;  %p176_p4 = scmp.eq.s32.totalorder %s682_s29, 1 }
   0xa   : > { %s959_s10 = scalar_select %p157_p1, %s871_s26, %s159_s8  }
   0xb   : > { %p961_p5 = por %p170_p2, %p169_p0  ;;  %p965_p6 = por %p176_p4, %p175_p3 }
   0xc   : > { %p685_p7 = scmp.ge.s32.totalorder %s875_s27, 1  ;;  %p242_p8 = scmp.lt.s32.totalorder %s875_s27, 3 }
   0xe   : > { %p243_p9 = pnand %p685_p7, %p242_p8 }
   0xf   : > { %p278_p10 = scmp.lt.s32.totalorder (!%p243_p9), %s944_s28, 1  ;;  %s1069_s0 = sld [smem:[#allocation5_spill]] (!%p243_p9) }
  0x10   : > { %246 = sbr.rel (%p243_p9) target bundleno = 1135 (0x46f), region = 44  ;;  %s877_s18 = smov (!%p243_p9), 127  }
  0x11   : > { %s268_s19 = sand.u32 (!%p243_p9), 1, %s867_s25   ;;  %s879_s22 = smov (!%p243_p9), 83  }
  0x12   : > { %s1001_s20 = sshll.u32 (!%p243_p9), %s268_s19, 3  ;;  %s880_s23 = smov (!%p243_p9), 98  }
  0x13   : > { %s270_s21 = scalar_lea.vmem (!%p243_p9), [#allocation2], %s1001_s20  ;;  %s881_s29 = smov (!%p243_p9), 113  }
  0x14   : > { %s575_s9 = scalar_lea.sflag (!%p243_p9), [#allocation3], %s268_s19 }
  0x15   : > { %s973_s13 = scalar_select %p278_p10, %s944_s28, 1  ;;  %vm297_vm0 = vcmask 1043456   ;;  %vm305_vm1 = vcmask 1044480   ;;  %v878_v3 = vmov 65535   ;;  %v300_v10 = vld [vmem:[%s1059_s1] sm:$0xf] }
  0x16   : > { %v306_v4 = vsel %vm297_vm0, 4294967295, %v878_v3  ;;  %vm301_vm2 = vcmask 72704   ;;  %v736_v15 = vld [vmem:[%s1060_s2] sm:$0xff]  ;;  %vm410_vm3 = vcmask 1046528   ;;  %v740_v17 = vld [vmem:[%s1061_s3 + $0x18] sm:$0xff]  ;;  %vm411_vm4 = vcmask 1047552  }
  0x17   : > { %s687_s14 = sshll.u32 %s973_s13, 1  ;;  %v307_v7 = vsel %vm305_vm1, %v306_v4, 0  ;;  %v412_v18 = vsel %vm410_vm3, 4294967295, %v878_v3  ;;  %v739_v21 = vld [vmem:[%s1061_s3 + $0x10] sm:$0xff]  ;;  %v738_v22 = vld [vmem:[%s1061_s3 + $0x8] sm:$0xff]  ;;  %v737_v24 = vld [vmem:[%s1061_s3] sm:$0xff] }
  0x18   : > { %s281_s17 = scalar_lea.vmem %s1069_s0, %s687_s14  ;;  %v413_v19 = vsel %vm411_vm4, %v412_v18, 0  ;;  %vm373_vm9 = vcmask 515072   ;;  %vm468_vm10 = vcmask 1040384   ;;  %v882_v49 = vmov 0   ;;  %v741_v61 = vld [vmem:[%s1062_s4] sm:$0xff]  ;;  %v743_v3 = vld [vmem:[%s1063_s5 + $0x8] sm:$0xff] }
  0x19   : > { %v288_v0 = vld [vmem:[%s281_s17] sm:$0x3]  ;;  %v415_v20 = vand.u32 %v740_v17, %v413_v19  ;;  %v470_v50 = vsel %vm468_vm10, 65535, %v882_v49  ;;  %vm464_vm11 = vcmask 531456   ;;  %vm505_vm12 = vcmask 138240   ;;  %s732_s17 = sshll.u32 %s944_s28, 3 }
  0x1a   : > { %v289_v1 = vunpack.c.l.bf16 %v288_v0  ;;  %v472_v51 = vand.u32 1.0|1.0, %v470_v50  ;;  %v742_v4 = vld [vmem:[%s1063_s5] sm:$0xff]  ;;  %s833_s0 = scalar_lea.hbm %s1064_s6, 16 }
  0x1b   : > { %421 = vmatpush.bf16.msra.mxu2 %v415_v20 }
  0x1c   : > { %292 = vst [vmem:[#allocation1 + $0x1] ss:$2 sm:$0xff] %v289_v1  ;;  %477 = vmatpush.bf16.msra.mxu3 %v472_v51 }
  0x1f   : > { %422 = vmatpush.bf16.msra.mxu2 %v739_v21 }
  0x23   : > { %v293_v2 = vld.sshfl [vmem:[#allocation1] sm:$0xff pattern:$0x75316420]  ;;  %423 = vmatpush.bf16.msra.mxu2 %v738_v22 }
  0x24   : > { %294 = vrot.lane.b32.xlu0 %v293_v2, %s877_s18 }
  0x27   : > { %424 = vmatpush.bf16.msra.mxu2 %v737_v24 }
  0x96   : > { %v295_v5 = vpop.permute.xlu0 %294 }
  0x97   : > { %v298_v6 = vsel %vm297_vm0, %v289_v1, %v295_v5 }
  0x98   : > { %v299_v8 = vpack.c.bf16 1.0, %v298_v6 }
  0x9a   : > { %v309_v9 = vand.u32 %v307_v7, %v299_v8 }
  0x9c   : > { %318 = vmatpush.bf16.msra.mxu0 %v309_v9 }
  0x9f   : > { %690 = vmatmul.msk.bf16.vlgmr.msra.gmra.mxu0 %vm301_vm2, %v300_v10 }
  0xa0   : > { %518 = vmatpush.bf16.msrb.mxu0 %v472_v51 }
 0x11c   : > { %v320_v11 = vpop.f32.mrf.mxu0 }
 0x11d   : > { %v324_v12 = vmax.f32 %v320_v11, 0.0 }
 0x11f   : > { %v325_v13 = vpack.c.bf16 1.0, %v324_v12 }
 0x121   : > { %v337_v14 = vand.u32 %v325_v13, %v307_v7 }
 0x123   : > { %346 = vmatpush.bf16.msra.mxu1 %v337_v14 }
 0x124   : > { %v322_v16 = vpop.f32.mrf.mxu0 }
 0x126   : > { %695 = vmatmul.msk.bf16.vlgmr.msra.gmra.mxu1 %vm301_vm2, %v736_v15 }
 0x127   : > { %744 = vmatpush.bf16.msrb.mxu1 %v472_v51 }
 0x1a3   : > { %v348_v23 = vpop.f32.mrf.mxu1 }
 0x1ab   : > { %v350_v25 = vpop.f32.mrf.mxu1 }
 0x1ac   : > { %v696_v26 = vmul.f32 -1.442695, %v350_v25 }
 0x1ae   : > { %801 = vpow2.f32 %v696_v26 }
 0x1b4   : > { %v802_v27 = vpop.eup %801 }
 0x1b5   : > { %v356_v28 = vadd.f32 1.0, %v802_v27 }
 0x1b7   : > { %803 = vrcp.f32 %v356_v28  ;;  %v368_v32 = vand.u32 2147483648, %v356_v28  ;;  %v366_v34 = vand.u32 2147483647, %v356_v28  ;;  %vm362_vm6 = vweird.f32 %v356_v28 }
 0x1b9   : > { %v369_v36 = vor.u32 1.1754944e-38, %v368_v32  ;;  %vm367_vm8 = vcmp.eq.f32.partialorder %v366_v34, 8.507059e+37 }
 0x1bd   : > { %v804_v29 = vpop.eup %803 }
 0x1be   : > { %v358_v30 = vmul.f32 %v804_v29, %v356_v28  ;;  %vm363_vm5 = vweird.f32 %v804_v29 }
 0x1bf   : > { %vm364_vm7 = vmor %vm362_vm6, %vm363_vm5 }
 0x1c0   : > { %v359_v31 = vsub.f32 1.0, %v358_v30 }
 0x1c2   : > { %v360_v33 = vmul.f32 %v804_v29, %v359_v31 }
 0x1c4   : > { %v361_v35 = vadd.f32 %v804_v29, %v360_v33 }
 0x1c6   : > { %v365_v37 = vsel %vm364_vm7, %v804_v29, %v361_v35 }
 0x1c7   : > { %v370_v38 = vsel %vm367_vm8, %v369_v36, %v365_v37 }
 0x1c8   : > { %v372_v39 = vmul.f32 %v370_v38, %v348_v23 }
 0x1ca   : > { %v375_v40 = vpack.c.bf16 %v372_v39, %v372_v39  ;;  %374 = vst.msk [vmem:[%s270_s21] sm:$0xff] %vm373_vm9, %v372_v39 }
 0x1cc   : > { %713 = vmatmul.msk.bf16.vlgmr.msra.gmra.mxu2 %vm373_vm9, %v375_v40 }
 0x24f   : > { %v426_v41 = vpop.f32.mrf.mxu2 }
 0x250   : > { %437 = vrot.lane.b32.xlu1 %v426_v41, %s879_s22  ;;  %434 = vrot.lane.b32.xlu0 %v426_v41, %s880_s23 }
 0x257   : > { %v428_v42 = vpop.f32.mrf.mxu2 }
 0x258   : > { %431 = vrot.lane.b32.xlu1 %v426_v41, %s881_s29  ;;  %s590_s29 = scalar_lea.hbm %s1064_s6, %s732_s17 }
 0x259   : > { %s594_s8 = sshll.u32 %s590_s29, 4  ;;  %s595_s8 = int_to_ptr.hbm [resolvable:$true] %s594_s8 }
 0x25a   : > { %s827_s14 = sshra.s32 %s595_s8, 4  ;;  %s828_s14 = int_to_ptr.hbm [resolvable:$true] %s827_s14 }
 0x25b   : > { %s829_s15 = scalar_lea.hbm %s828_s14, 8  ;;  %p834_p0 = scmp.lt.s32.totalorder %s828_s14, %s1064_s6 }
 0x25c   : > { %p830_p11 = scmp.ne.s32.totalorder %s828_s14, %s829_s15  ;;  %p835_p1 = scmp.lt.s32.totalorder %s833_s0, %s829_s15 }
 0x25e   : > { %p831_p12 = pnand %p830_p11, %p961_p5  ;;  %p836_p2 = por %p835_p1, %p834_p0 }
 0x260   : > { %p832_p13 = pneg %p831_p12 }
 0x262   : > { %p837_p3 = pnand %p836_p2, %p832_p13 }
 0x2c2   : > { %v438_v43 = vpop.permute.xlu1 %437  ;;  %v435_v44 = vpop.permute.xlu0 %434 }
 0x2c3   : > { %v453_v45 = vpack.c.bf16 %v438_v43, %v435_v44  ;;  %v791_v46 = vpack.i.bf16 %v438_v43, %v435_v44 }
 0x2c5   : > { %792 = vrot.lane.b32.xlu2 %v791_v46, %s877_s18 }
 0x2ca   : > { %v432_v47 = vpop.permute.xlu1 %431 }
 0x2cb   : > { %v796_v48 = vpack.i.bf16 %v432_v47, %v426_v41  ;;  %v452_v60 = vpack.c.bf16 %v432_v47, %v426_v41 }
 0x2cd   : > { %797 = vrot.lane.b32.xlu2 %v796_v48, %s877_s18  ;;  %s592_s18 = sshll.u32 %s270_s21, 4  ;;  %s593_s18 = int_to_ptr.vmem [resolvable:$true] %s592_s18 }
 0x31f   : > { %v793_v52 = vpop.permute.xlu2 %792 }
 0x320   : > { %v795_v53 = vunpack.i.h.bf16 %v793_v52  ;;  %v794_v54 = vunpack.i.l.bf16 %v793_v52 }
 0x322   : > { %v455_v55 = vpack.c.bf16 %v795_v53, %v794_v54 }
 0x324   : > { %478 = vmatpush.bf16.msra.mxu3 %v455_v55 }
 0x327   : > { %v798_v56 = vpop.permute.xlu2 %797 }
 0x328   : > { %v800_v57 = vunpack.i.h.bf16 %v798_v56  ;;  %v799_v58 = vunpack.i.l.bf16 %v798_v56 }
 0x32a   : > { %v454_v59 = vpack.c.bf16 %v800_v57, %v799_v58 }
 0x32c   : > { %479 = vmatpush.bf16.msra.mxu3 %v454_v59 }
 0x330   : > { %480 = vmatpush.bf16.msra.mxu3 %v453_v45 }
 0x334   : > { %481 = vmatpush.bf16.msra.mxu3 %v452_v60 }
 0x337   : > { %718 = vmatmul.msk.bf16.vlgmr.msra.gmra.mxu3 %vm464_vm11, %v741_v61 }
 0x3ba   : > { %v483_v62 = vpop.f32.mrf.mxu3 }
 0x3bb   : > { %v488_v0 = vmax.f32 %v483_v62, 0.0 }
 0x3c2   : > { %v485_v63 = vpop.f32.mrf.mxu3 }
 0x3c3   : > { %v489_v1 = vmax.f32 %v485_v63, 0.0 }
 0x3c5   : > { %v490_v2 = vpack.c.bf16 %v489_v1, %v488_v0 }
 0x3c7   : > { %519 = vmatpush.bf16.msrb.mxu0 %v490_v2  ;;  %745 = vmatpush.bf16.msrb.mxu1 %v490_v2 }
 0x3ca   : > { %728 = vmatmul.msk.bf16.vlgmr.msrb.gmra.mxu1 %vm505_vm12, %v743_v3  ;;  %727 = vmatmul.msk.bf16.vlgmr.msrb.gmra.mxu0 %vm505_vm12, %v742_v4 }
 0x3cb   : > { %840 = shalt.err (!%p837_p3)
}
 0x3cc   : > { %746 = dma.vmem_to_hbm [thread:$0]  (%p961_p5), %s593_s18, 128, %s595_s8, %s575_s9   ;;  %vm571_vm1 = vcmask 113664  }
 0x3cd   : > { %s735_s0 = sshll.u32 %s973_s13, 4 }
 0x3ce   : > { %s286_s20 = scalar_lea.vmem %s1065_s7, %s735_s0 }
 0x447   : > { %v526_v5 = vpop.f32.mrf.mxu1  ;;  %v521_v21 = vpop.f32.mrf.mxu0 }
 0x448   : > { %v729_v6 = vmul.f32 -1.442695, %v526_v5 }
 0x44a   : > { %805 = vpow2.f32 %v729_v6 }
 0x44f   : > { %v528_v7 = vpop.f32.mrf.mxu1  ;;  %v523_v34 = vpop.f32.mrf.mxu0 }
 0x450   : > { %v806_v8 = vpop.eup %805  ;;  %v730_v9 = vmul.f32 -1.442695, %v528_v7 }
 0x451   : > { %v537_v10 = vadd.f32 1.0, %v806_v8 }
 0x452   : > { %807 = vpow2.f32 %v730_v9 }
 0x453   : > { %809 = vrcp.f32 %v537_v10  ;;  %v550_v16 = vand.u32 2147483648, %v537_v10  ;;  %v548_v18 = vand.u32 2147483647, %v537_v10  ;;  %vm544_vm14 = vweird.f32 %v537_v10 }
 0x455   : > { %v551_v22 = vor.u32 1.1754944e-38, %v550_v16  ;;  %vm549_vm0 = vcmp.eq.f32.partialorder %v548_v18, 8.507059e+37 }
 0x458   : > { %v808_v11 = vpop.eup %807 }
 0x459   : > { %v810_v12 = vpop.eup %809  ;;  %v538_v13 = vadd.f32 1.0, %v808_v11 }
 0x45a   : > { %v540_v14 = vmul.f32 %v810_v12, %v537_v10  ;;  %vm545_vm13 = vweird.f32 %v810_v12 }
 0x45b   : > { %811 = vrcp.f32 %v538_v13  ;;  %vm546_vm15 = vmor %vm544_vm14, %vm545_vm13  ;;  %v565_v28 = vand.u32 2147483648, %v538_v13  ;;  %v563_v30 = vand.u32 2147483647, %v538_v13  ;;  %vm559_vm3 = vweird.f32 %v538_v13 }
 0x45c   : > { %v541_v15 = vsub.f32 1.0, %v540_v14 }
 0x45d   : > { %v566_v32 = vor.u32 1.1754944e-38, %v565_v28  ;;  %vm564_vm5 = vcmp.eq.f32.partialorder %v563_v30, 8.507059e+37 }
 0x45e   : > { %v542_v17 = vmul.f32 %v810_v12, %v541_v15 }
 0x460   : > { %v543_v19 = vadd.f32 %v810_v12, %v542_v17 }
 0x461   : > { %v812_v20 = vpop.eup %811 }
 0x462   : > { %v547_v23 = vsel %vm546_vm15, %v810_v12, %v543_v19  ;;  %v555_v24 = vmul.f32 %v812_v20, %v538_v13  ;;  %vm560_vm2 = vweird.f32 %v812_v20 }
 0x463   : > { %v552_v25 = vsel %vm549_vm0, %v551_v22, %v547_v23  ;;  %vm561_vm4 = vmor %vm559_vm3, %vm560_vm2 }
 0x464   : > { %v569_v26 = vmul.f32 %v552_v25, %v521_v21  ;;  %v556_v27 = vsub.f32 1.0, %v555_v24 }
 0x466   : > { %572 = vst.msk [vmem:[%s286_s20] sm:$0xff] %vm571_vm1, %v569_v26  ;;  %v557_v29 = vmul.f32 %v812_v20, %v556_v27 }
 0x468   : > { %v558_v31 = vadd.f32 %v812_v20, %v557_v29 }
 0x46a   : > { %v562_v33 = vsel %vm561_vm4, %v812_v20, %v558_v31 }
 0x46b   : > { %v567_v35 = vsel %vm564_vm5, %v566_v32, %v562_v33 }
 0x46c   : > { %v570_v36 = vmul.f32 %v567_v35, %v523_v34 }
 0x46e   : > { %573 = vst.msk [vmem:[%s286_s20 + $0x8] sm:$0xff] %vm571_vm1, %v570_v36 }
 0x46f PF: > { %p752_p4 = scmp.ge.s32.totalorder %s875_s27, 2  ;;  %s609_s13 = sand.u32 1, %s863_s24  }
 0x470   : > { %s610_s21 = scalar_lea.sflag [#allocation3], %s609_s13 }
 0x471   : > { %p749_p5 = pnand %p752_p4, %p965_p6 }
 0x473   : > { %p750_p7 = pneg %p749_p5 }
 0x475   : > { %858 = dma.done.wait (%p750_p7), %s610_s21, 128  }
 0x476   : > { %860 = vsyncadd (%p750_p7), %s610_s21, 4294967168  ;;  %p18_p8 = scmp.ge.s32.totalorder %s948_s30, 4   ;;  %s1070_s24 = smov %s867_s25 }
 0x477   : > { %s1071_s25 = smov %s871_s26  ;;  %s1072_s26 = smov %s959_s10 }
 0x478   : > { %s1073_s27 = smov %s948_s30  ;;  %20 = sbr.rel (!%p18_p8) target bundleno = 5 (0x5), region = 92 }
 0x47d   :  { %624 = vsyncpa [#allocation3], 1 }
 0x47e   :  { %626 = vsyncpa [#allocation3 + $0x1], 1 }

</bundles_post_ra>
